<compile_context>
chip_gen: v7x
topology: tpu7x:2x2x1
jax: 0.10.0
libtpu: 0.0.40
codegen_flags: <defaults>
</compile_context>

<pallas_src>
import jax
import jax.numpy as jnp
from jax.experimental import pallas as pl
from jax.experimental.pallas import tpu as pltpu


def linear_fused_kernel(x_ref, w_ref, b_ref, o_ref):
    # x_ref: (TB, D), w_ref: (D, D) holding (W^T - I), b_ref: (1, D) f32,
    # o_ref: (TB, D).  y = x @ (W^T - I) + b  ==  Linear(x) - x.
    y = jnp.dot(x_ref[...], w_ref[...], preferred_element_type=jnp.float32)
    o_ref[...] = (y + b_ref[...]).astype(o_ref.dtype)


def prepare_params(w, b, *, compute_dtype=None):
    """One-time (outside the hot path) parameter preparation.

    w: (D_out, D_in) PyTorch layout, b: (D_out,).
    Returns (w_eff, b2) with w_eff = W^T - I (the `-x` fold, done in f32) and
    b2 = b reshaped to (1, D_out), kept in f32 for an f32 bias add.
    If compute_dtype is given (e.g. bf16), only w_eff is downcast.
    """
    D_out, D_in = w.shape
    assert D_in == D_out, "forward `v1 - x` requires input_dim == output_dim"
    w_eff = w.T - jnp.eye(D_in, dtype=w.dtype)      # exact fold in f32
    if compute_dtype is not None:
        w_eff = w_eff.astype(compute_dtype)
    b2 = b.reshape(1, D_out).astype(jnp.float32)    # bias add stays f32
    return w_eff, b2


def _choose_tb(B):
    """Pick the batch tile: big tiles for DMA/overhead efficiency, but keep
    >= 2 grid steps when possible so v7x's two TensorCores both get work."""
    if B <= 16:
        return B
    tb = min(2048, B // 2)          # >= 2 steps, plateau of HBM roofline
    tb = max(8, (tb // 8) * 8)      # sublane (8) aligned tile
    return tb


def model_forward(x, w_eff, b2, *, tb=None):
    """x: (B, D); w_eff: (D, D) = W^T - I; b2: (1, D) f32."""
    B, D = x.shape
    assert w_eff.shape == (D, D) and b2.shape == (1, D)
    TB = _choose_tb(B) if tb is None else max(1, min(tb, B))
    grid = (pl.cdiv(B, TB),)

    itemsize = jnp.dtype(x.dtype).itemsize
    cost = pl.CostEstimate(
        flops=2 * B * D * D,
        transcendentals=0,
        bytes_accessed=(2 * B * D * itemsize                      # x in, out
                        + D * D * jnp.dtype(w_eff.dtype).itemsize  # weights
                        + D * 4),                                  # bias (f32)
    )

    return pl.pallas_call(
        linear_fused_kernel,
        out_shape=jax.ShapeDtypeStruct((B, D), x.dtype),
        grid_spec=pltpu.PrefetchScalarGridSpec(
            num_scalar_prefetch=0,
            grid=grid,
            in_specs=[
                pl.BlockSpec((TB, D), lambda i: (i, 0)),   # x: tiled over batch
                pl.BlockSpec((D, D), lambda i: (0, 0)),    # W^T - I: VMEM-resident
                pl.BlockSpec((1, D), lambda i: (0, 0)),    # bias: VMEM-resident
            ],
            out_specs=pl.BlockSpec((TB, D), lambda i: (i, 0)),
        ),
        compiler_params=pltpu.CompilerParams(
            dimension_semantics=("parallel",)),  # shards steps across v7x TCs
        cost_estimate=cost,
    )(x, w_eff, b2)


if __name__ == "__main__":
    B = 256   # -> TB=128, grid=(2,): one step per v7x TensorCore
    D = 128   # input_dim == output_dim (required by `v1 - x`)

    key = jax.random.PRNGKey(0)
    kx, kw, kb = jax.random.split(key, 3)

    x = jax.random.normal(kx, (B, D), dtype=jnp.float32)
    # Deterministic Linear params (PyTorch layout: W (out, in), b (out,))
    bound = 1.0 / (D ** 0.5)
    w = jax.random.uniform(kw, (D, D), dtype=jnp.float32, minval=-bound, maxval=bound)
    b = jax.random.uniform(kb, (D,), dtype=jnp.float32, minval=-bound, maxval=bound)

    ref = x @ w.T + b - x  # reference (original PyTorch formulation)

    fwd = jax.jit(model_forward)

    # --- f32 path: exact-ish check -------------------------------------
    w_eff, b2 = prepare_params(w, b)
    w_eff, b2 = jax.block_until_ready((w_eff, b2))
    out = jax.block_until_ready(fwd(x, w_eff, b2))
    assert out.shape == (B, D)
    assert jnp.allclose(out, ref, atol=1e-5, rtol=1e-5)

    # --- ragged-batch path (B not a multiple of TB, exercises cdiv grid) ---
    Br = 200
    xr = x[:Br]
    out_r = jax.block_until_ready(jax.jit(model_forward)(xr, w_eff, b2))
    assert out_r.shape == (Br, D)
    assert jnp.allclose(out_r, ref[:Br], atol=1e-5, rtol=1e-5)

    # --- bf16 compute path: halves HBM traffic, relaxed tolerance -------
    w_eff_bf16, b2f = prepare_params(w, b, compute_dtype=jnp.bfloat16)
    x_bf16 = x.astype(jnp.bfloat16)
    out_bf16 = jax.block_until_ready(jax.jit(model_forward)(x_bf16, w_eff_bf16, b2f))
    assert out_bf16.shape == (B, D)
    assert jnp.allclose(out_bf16.astype(jnp.float32), ref, atol=5e-2, rtol=5e-2)

    print("KERNEL_OK")
</pallas_src>

<mosaic_0001>
module attributes {stable_mosaic.version = 11 : i64} {
  func.func @linear_fused_kernel(%arg0: i32, %arg1: memref<128x128xf32, #tpu.memory_space<vmem>>, %arg2: memref<128x128xf32, #tpu.memory_space<vmem>>, %arg3: memref<1x128xf32, #tpu.memory_space<vmem>>, %arg4: memref<128x128xf32, #tpu.memory_space<vmem>>) attributes {dimension_semantics = [#tpu.dimension_semantics<parallel>], iteration_bounds = array<i64: 2>, scalar_prefetch = 0 : i64, scratch_operands = 0 : i64, tpu.core_type = #tpu.core_type<tc>, window_params = [{transform_indices = @transform_0, window_bounds = array<i64: 128, 128>}, {pipeline_mode = #tpu.pipeline_mode<synchronous>, transform_indices = @transform_1, window_bounds = array<i64: 128, 128>}, {pipeline_mode = #tpu.pipeline_mode<synchronous>, transform_indices = @transform_2, window_bounds = array<i64: 1, 128>}, {transform_indices = @transform_3, window_bounds = array<i64: 128, 128>}]} {
    %c0 = arith.constant 0 : index
    %c0_0 = arith.constant 0 : index
    %0 = vector.load %arg1[%c0, %c0_0] : memref<128x128xf32, #tpu.memory_space<vmem>>, vector<128x128xf32>
    %c0_1 = arith.constant 0 : index
    %c0_2 = arith.constant 0 : index
    %1 = vector.load %arg2[%c0_1, %c0_2] : memref<128x128xf32, #tpu.memory_space<vmem>>, vector<128x128xf32>
    %cst = arith.constant dense<0.000000e+00> : vector<128x128xf32>
    %2 = tpu.matmul %0, %1, %cst {dimension_numbers = #tpu.dot_dimension_numbers<[1], [0], [0], [1], [0, 0, 1, 1], [], []>} : vector<128x128xf32>, vector<128x128xf32>, vector<128x128xf32> -> vector<128x128xf32>
    %c0_3 = arith.constant 0 : index
    %c0_4 = arith.constant 0 : index
    %3 = vector.load %arg3[%c0_3, %c0_4] : memref<1x128xf32, #tpu.memory_space<vmem>>, vector<1x128xf32>
    %4 = vector.broadcast %3 : vector<1x128xf32> to vector<128x128xf32>
    %5 = arith.addf %2, %4 : vector<128x128xf32>
    %c0_5 = arith.constant 0 : index
    %c0_6 = arith.constant 0 : index
    %6 = vector.load %arg4[%c0_5, %c0_6] : memref<128x128xf32, #tpu.memory_space<vmem>>, vector<128x128xf32>
    tpu.vector_store %arg4[%c0_5, %c0_6], %5 {strides = array<i32>} : memref<128x128xf32, #tpu.memory_space<vmem>>, vector<128x128xf32>,
    return
  }
  func.func @transform_0(%arg0: i32) -> (i32, i32) {
    %c0_i32 = arith.constant 0 : i32
    %c0_i32_0 = arith.constant 0 : i32
    return %arg0, %c0_i32 : i32, i32
  }
  func.func @transform_1(%arg0: i32) -> (i32, i32) {
    %c0_i32 = arith.constant 0 : i32
    %c0_i32_0 = arith.constant 0 : i32
    %c0_i32_1 = arith.constant 0 : i32
    return %c0_i32, %c0_i32_0 : i32, i32
  }
  func.func @transform_2(%arg0: i32) -> (i32, i32) {
    %c0_i32 = arith.constant 0 : i32
    %c0_i32_0 = arith.constant 0 : i32
    %c0_i32_1 = arith.constant 0 : i32
    return %c0_i32, %c0_i32_0 : i32, i32
  }
  func.func @transform_3(%arg0: i32) -> (i32, i32) {
    %c0_i32 = arith.constant 0 : i32
    %c0_i32_0 = arith.constant 0 : i32
    return %arg0, %c0_i32 : i32, i32
  }
}

</mosaic_0001>

<bundles_post_ra>
// kernel: model_forward.1
= control target key start
LH: loop header
LB: loop body
LE: loop exit
PB: predicated region body
PF: predicated region fallthrough
CT: control target
= control target key end

     0   :  { %8 = vsyncpa [#allocation3], 0  ;;  %s1127_s0 = inlined_call_operand.hbm [shape: f32[256,128], index: 0, kind: input, shape index: {}]   ;;  %s1128_s1 = inlined_call_operand.hbm [shape: f32[128,128], index: 1, kind: input, shape index: {}]   ;;  %s1129_s2 = inlined_call_operand.vmem [shape: f32[1,128], index: 2, kind: input, shape index: {}]   ;;  %s1130_s3 = inlined_call_operand.hbm [shape: f32[256,128], index: 3, kind: output, shape index: {}]  }
   0x1   :  { %10 = vsyncpa [#allocation3 + $0x1], 0 }
   0x2   :  { %11 = vsyncpa [#allocation6], 0 }
   0x3   :  { %12 = vsyncpa [#allocation4], 0 }
   0x4   :  { %14 = vsyncpa [#allocation4 + $0x1], 0  ;;  %s876_s12 = smov 0   ;;  %s878_s13 = smov 0  }
   0x5   :  { %s880_s14 = smov 0   ;;  %s882_s15 = smov 0  }
   0x6 LB: > { %s897_s16 = sadd.s32 4294967295, %s847_s15   ;;  %s503_s17 = sadd.s32 4294967294, %s847_s15   ;;  %s847_s15 = sphi %s882_s15, %s1150_s15   ;;  %s843_s14 = sphi %s880_s14, %s1149_s14   ;;  %s839_s13 = sphi %s878_s13, %s1148_s13   ;;  %s835_s12 = sphi %s876_s12, %s1147_s12  }
   0x7   : > { %p40_p0 = scmp.ne.s32.totalorder %s839_s13, %s835_s12  ;;  %p1131_p1 = scmp.eq.s32.totalorder %s897_s16, 0 }
   0x8   : > { %p112_p3 = scmp.eq.s32.totalorder %s503_s17, 1  ;;  %p504_p5 = scmp.ge.s32.totalorder %s847_s15, 1 }
   0x9   : > { %p906_p4 = por %p1131_p1, %p40_p0  ;;  %p119_p7 = scmp.lt.s32.totalorder %s847_s15, 3 }
   0xa   : > { %p911_p6 = por %p112_p3, %p40_p0  ;;  %s849_s21 = smov [#allocation5]  }
   0xb   : > { %s1134_s18 = scalar_select %p906_p4, 1, 0 }
   0xc   : > { %s1135_s19 = scalar_select %p911_p6, 1, 0 }
   0xd   : > { %p916_p8 = pnand %p504_p5, %p119_p7  ;;  %s131_s22 = sshll.u32 %s849_s21, 4  ;;  %s920_s22 = int_to_ptr.vmem [resolvable:$true] %s131_s22 }
   0xe   : > { %s932_s24 = sadd.s32 1, %s847_s15   ;;  %s27_s25 = sadd.s32 1, %s843_s14 }
   0xf   : > { %s1136_s20 = scalar_select %p916_p8, 1, 0 }
  0x10   : > { %p666_p9 = pneg %p916_p8  ;;  %s24_s26 = ssub.s32 %s847_s15, %s932_s24 }
  0x11   : > { %s719_s29 = scalar_lea.hbm %s1128_s1, 2048 }
  0x12   : > { %p927_p11 = pnand %p666_p9, %p1131_p1  ;;  %p720_p12 = scmp.ne.s32.totalorder %s1128_s1, %s719_s29 }
  0x13   : > { %p726_p5 = scmp.lt.u32.totalorder %s719_s29, %s1128_s1 }
  0x14   : > { %p721_p13 = pneg %p927_p11 }
  0x16   : > { %p722_p0 = pnand %p721_p13, %p720_p12 }
  0x18   : > { %p723_p3 = pneg %p722_p0 }
  0x1a   : > { %p728_p7 = pnand %p726_p5, %p723_p3 }
  0x1c   : > { %731 = shalt.err (!%p728_p7)
}
  0x1d   : > { %s732_s7 = scalar_lea.vmem %s920_s22, 2048  ;;  %p740_p2 = scmp.lt.s32.totalorder %s920_s22, %s920_s22 }
  0x1e   : > { %p733_p9 = scmp.ne.s32.totalorder %s920_s22, %s732_s7  ;;  %p741_p6 = scmp.lt.s32.totalorder %s732_s7, %s732_s7 }
  0x20   : > { %p735_p10 = pnand %p733_p9, %p721_p13  ;;  %p742_p4 = por %p741_p6, %p740_p2 }
  0x22   : > { %p736_p1 = pneg %p735_p10 }
  0x24   : > { %p743_p8 = pnand %p742_p4, %p736_p1 }
  0x26   : > { %746 = shalt.err (!%p743_p8)
}
  0x27   : > { %s850_s8 = smov 128   ;;  %s851_s9 = smov 8  }
  0x28   : > { %669 = dma.hbm_to_vmem [thread:$0]  (!%p927_p11), %s1128_s1, 2048, %s920_s22, [#allocation6], %s850_s8, %s850_s8, %s851_s9  }
  0x29   : > { %p25_p1 = scmp.eq.s32.totalorder %s24_s26, 0  ;;  %p34_p2 = scmp.ne.s32.totalorder %s843_s14, %s839_s13 }
  0x2a   : > { %p35_p4 = scmp.eq.s32.totalorder %s847_s15, 0  ;;  %p679_p6 = scmp.lt.s32.totalorder %s847_s15, 2 }
  0x2b   : > { %s966_s17 = scalar_select %p25_p1, %s843_s14, %s27_s25  }
  0x2c   : > { %p36_p8 = por %p35_p4, %p34_p2  ;;  %p1138_p10 = scmp.eq.s32.totalorder %s897_s16, 1 }
  0x2d   : > { %s148_s23 = sand.u32 1, %s843_s14   ;;  %s520_s27 = sshll.u32 %s847_s15, 11 }
  0x2e   : > { %p970_p12 = por %p1138_p10, %p34_p2  ;;  %s507_s28 = sshll.u32 %s148_s23, 7 }
  0x2f   : > { %s979_s4 = scalar_lea.hbm %s1127_s0, %s520_s27  ;;  %s152_s22 = scalar_lea.vmem [#allocation2], %s507_s28 }
  0x30   : > { %s159_s25 = sshll.u32 %s152_s22, 4  ;;  %p981_p11 = pnand %p679_p6, %p36_p8  ;;  %s985_s25 = int_to_ptr.vmem [resolvable:$true] %s159_s25 }
  0x31   : > { %s987_s5 = scalar_lea.sflag [#allocation3], %s148_s23  ;;  %s747_s6 = scalar_lea.hbm %s979_s4, 2048 }
  0x32   : > { %p748_p13 = scmp.ne.s32.totalorder %s979_s4, %s747_s6  ;;  %p749_p0 = pneg %p981_p11 }
  0x33   : > { %s752_s11 = scalar_lea.hbm %s1127_s0, 4096  ;;  %p753_p7 = scmp.lt.u32.totalorder %s979_s4, %s1127_s0 }
  0x34   : > { %p750_p3 = pnand %p749_p0, %p748_p13  ;;  %p754_p9 = scmp.lt.u32.totalorder %s752_s11, %s747_s6 }
  0x35   : > { %p756_p2 = scmp.lt.u32.totalorder %s747_s6, %s979_s4 }
  0x36   : > { %p751_p5 = pneg %p750_p3  ;;  %p755_p1 = por %p754_p9, %p753_p7 }
  0x38   : > { %p757_p4 = por %p756_p2, %p755_p1 }
  0x3a   : > { %p758_p6 = pnand %p757_p4, %p751_p5 }
  0x3c   : > { %761 = shalt.err (!%p758_p6)
}
  0x3d   : > { %s762_s23 = scalar_lea.vmem %s985_s25, 2048  ;;  %s852_s29 = smov [#allocation2]  }
  0x3e   : > { %p763_p8 = scmp.ne.s32.totalorder %s985_s25, %s762_s23  ;;  %s767_s30 = sshll.u32 %s852_s29, 4  ;;  %s768_s30 = int_to_ptr.vmem [resolvable:$false] %s767_s30 }
  0x3f   : > { %s769_s22 = scalar_lea.vmem %s768_s30, 4096  ;;  %p770_p3 = scmp.lt.s32.totalorder %s985_s25, %s768_s30 }
  0x40   : > { %p765_p10 = pnand %p763_p8, %p749_p0  ;;  %p771_p7 = scmp.lt.s32.totalorder %s769_s22, %s762_s23 }
  0x42   : > { %p766_p13 = pneg %p765_p10  ;;  %p772_p9 = por %p771_p7, %p770_p3 }
  0x44   : > { %p773_p1 = pnand %p772_p9, %p766_p13 }
  0x46   : > { %776 = shalt.err (!%p773_p1)
}
  0x47   : > { %673 = dma.hbm_to_vmem [thread:$0]  (!%p981_p11), %s979_s4, 2048, %s985_s25, %s987_s5, %s850_s8, %s850_s8, %s851_s9  }
  0x48   : > { %p1141_p0 = scmp.ne.s32.totalorder %s1136_s20, 0 }
  0x49   : > { %s1021_s6 = sand.u32 (!%p1141_p0), 1, %s839_s13   ;;  %p1142_p5 = scmp.ne.s32.totalorder (!%p1141_p0), %s1134_s18, 0 }
  0x4a   : > { %171 = sbr.rel (%p1141_p0) target bundleno = 362 (0x16a), region = 32  ;;  %s511_s7 = sshll.u32 (!%p1141_p0), %s1021_s6, 7 }
  0x4b   : > { %s174_s10 = scalar_lea.sflag (!%p1141_p0), [#allocation3], %s1021_s6  ;;  %s1027_s26 = scalar_lea.vmem (!%p1141_p0), [#allocation2], %s511_s7 }
  0x51   : > { %822 = dma.done.wait (%p1142_p5), %s174_s10, 2048  }
  0x52   : > { %824 = vsyncadd (%p1142_p5), %s174_s10, 4294965248  ;;  %p1143_p11 = scmp.eq.s32.totalorder %s897_s16, 0 }
  0x54   : > { %826 = dma.done.wait (%p1143_p11), [#allocation6], 2048   ;;  %p1144_p2 = pmov %p1143_p11 }
  0x55   : > { %v222_v0 = vld [vmem:[#allocation5] sm:$0xff]  ;;  %v223_v1 = vld [vmem:[#allocation5 + $0x8] sm:$0xff]  ;;  %v224_v2 = vld [vmem:[#allocation5 + $0x10] sm:$0xff]  ;;  %s1058_s8 = scalar_lea.vmem [#allocation7], %s511_s7  ;;  %s521_s9 = sshll.u32 %s897_s16, 11 }
  0x56   : > { %828 = vsyncadd (%p1144_p2), [#allocation6], 4294965248  ;;  %v610_v3 = vpack.c.bf16 %v223_v1, %v222_v0  ;;  %v225_v4 = vld [vmem:[#allocation5 + $0x18] sm:$0xff]  ;;  %v226_v6 = vld [vmem:[#allocation5 + $0x20] sm:$0xff]  ;;  %s420_s4 = sshll.u32 %s1058_s8, 4  ;;  %s1077_s16 = scalar_lea.hbm %s1130_s3, %s521_s9  ;;  %s1079_s4 = int_to_ptr.vmem [resolvable:$true] %s420_s4 }
  0x57   : > { %v614_v5 = vpack.c.bf16 %v225_v4, %v224_v2  ;;  %v227_v7 = vld [vmem:[#allocation5 + $0x28] sm:$0xff]  ;;  %v206_v9 = vld [vmem:[%s1027_s26] sm:$0xff]  ;;  %v228_v11 = vld [vmem:[#allocation5 + $0x30] sm:$0xff]  ;;  %s407_s11 = scalar_lea.sflag [#allocation4], %s1021_s6  ;;  %s777_s27 = scalar_lea.vmem %s1079_s4, 2048 }
  0x58   : > { %611 = vmatprep.subr.bf16.mxu0 %v610_v3  ;;  %642 = vmatprep.subr.bf16.mxu1 %v610_v3  ;;  %v618_v8 = vpack.c.bf16 %v227_v7, %v226_v6  ;;  %v214_v10 = vld [vmem:[%s1027_s26 + $0x40] sm:$0xff]  ;;  %v229_v12 = vld [vmem:[#allocation5 + $0x38] sm:$0xff]  ;;  %v231_v15 = vld [vmem:[#allocation5 + $0x48] sm:$0xff]  ;;  %p778_p4 = scmp.ne.s32.totalorder %s1079_s4, %s777_s27  ;;  %s853_s28 = smov [#allocation7]  }
  0x59   : > { %613 = vmatpush3.bf16.msra.mxu0 %v610_v3  ;;  %650 = vmatpush3.bf16.msra.mxu1 %v610_v3  ;;  %v622_v13 = vpack.c.bf16 %v229_v12, %v228_v11  ;;  %v230_v14 = vld [vmem:[#allocation5 + $0x40] sm:$0xff]  ;;  %v232_v17 = vld [vmem:[#allocation5 + $0x50] sm:$0xff]  ;;  %v233_v18 = vld [vmem:[#allocation5 + $0x58] sm:$0xff]  ;;  %s781_s23 = sshll.u32 %s853_s28, 4  ;;  %s782_s23 = int_to_ptr.vmem [resolvable:$false] %s781_s23 }
  0x5a   : > { %615 = vmatprep.subr.bf16.mxu0 %v614_v5  ;;  %643 = vmatprep.subr.bf16.mxu1 %v614_v5  ;;  %v626_v16 = vpack.c.bf16 %v231_v15, %v230_v14  ;;  %v630_v19 = vpack.c.bf16 %v233_v18, %v232_v17  ;;  %v234_v20 = vld [vmem:[#allocation5 + $0x60] sm:$0xff]  ;;  %v235_v21 = vld [vmem:[#allocation5 + $0x68] sm:$0xff]  ;;  %v236_v23 = vld [vmem:[#allocation5 + $0x70] sm:$0xff]  ;;  %p779_p6 = pnand %p778_p4, %p970_p12  ;;  %s783_s29 = scalar_lea.vmem %s782_s23, 4096 }
  0x5b   : > { %586 = vmatprep.mubr.f32.mxu0 %v206_v9  ;;  %598 = vmatprep.mubr.f32.mxu1 %v214_v10  ;;  %v634_v22 = vpack.c.bf16 %v235_v21, %v234_v20  ;;  %v237_v24 = vld [vmem:[#allocation5 + $0x78] sm:$0xff]  ;;  %v207_v26 = vld [vmem:[%s1027_s26 + $0x8] sm:$0xff]  ;;  %v208_v28 = vld [vmem:[%s1027_s26 + $0x10] sm:$0xff]  ;;  %p784_p10 = scmp.lt.s32.totalorder %s1079_s4, %s782_s23  ;;  %p785_p13 = scmp.lt.s32.totalorder %s783_s29, %s777_s27 }
  0x5c   : > { %v638_v25 = vpack.c.bf16 %v237_v24, %v236_v23  ;;  %v215_v27 = vld [vmem:[%s1027_s26 + $0x48] sm:$0xff]  ;;  %v216_v29 = vld [vmem:[%s1027_s26 + $0x50] sm:$0xff]  ;;  %v209_v30 = vld [vmem:[%s1027_s26 + $0x18] sm:$0xff]  ;;  %p780_p8 = pneg %p779_p6 }
  0x5d   : > { %617 = vmatpush3.bf16.msra.mxu0 %v614_v5  ;;  %651 = vmatpush3.bf16.msra.mxu1 %v614_v5  ;;  %v217_v31 = vld [vmem:[%s1027_s26 + $0x58] sm:$0xff]  ;;  %v210_v32 = vld [vmem:[%s1027_s26 + $0x20] sm:$0xff]  ;;  %v211_v34 = vld [vmem:[%s1027_s26 + $0x28] sm:$0xff]  ;;  %p786_p3 = por %p785_p13, %p784_p10 }
  0x5e   : > { %619 = vmatprep.subr.bf16.mxu0 %v618_v8  ;;  %644 = vmatprep.subr.bf16.mxu1 %v618_v8  ;;  %v218_v33 = vld [vmem:[%s1027_s26 + $0x60] sm:$0xff]  ;;  %v219_v35 = vld [vmem:[%s1027_s26 + $0x68] sm:$0xff]  ;;  %v212_v36 = vld [vmem:[%s1027_s26 + $0x30] sm:$0xff] }
  0x5f   : > { %v220_v37 = vld [vmem:[%s1027_s26 + $0x70] sm:$0xff]  ;;  %v213_v38 = vld [vmem:[%s1027_s26 + $0x38] sm:$0xff]  ;;  %v514_v40 = vld [vmem:[%s1129_s2] ss:$0 sm:$0xff]  ;;  %p787_p7 = pnand %p786_p3, %p780_p8 }
  0x60   : > { %v221_v39 = vld [vmem:[%s1027_s26 + $0x78] sm:$0xff] }
  0x61   : > { %621 = vmatpush3.bf16.msra.mxu0 %v618_v8  ;;  %652 = vmatpush3.bf16.msra.mxu1 %v618_v8 }
  0x62   : > { %623 = vmatprep.subr.bf16.mxu0 %v622_v13  ;;  %645 = vmatprep.subr.bf16.mxu1 %v622_v13 }
  0x65   : > { %625 = vmatpush3.bf16.msra.mxu0 %v622_v13  ;;  %653 = vmatpush3.bf16.msra.mxu1 %v622_v13 }
  0x66   : > { %627 = vmatprep.subr.bf16.mxu0 %v626_v16  ;;  %646 = vmatprep.subr.bf16.mxu1 %v626_v16 }
  0x69   : > { %629 = vmatpush3.bf16.msra.mxu0 %v626_v16  ;;  %654 = vmatpush3.bf16.msra.mxu1 %v626_v16 }
  0x6a   : > { %631 = vmatprep.subr.bf16.mxu0 %v630_v19  ;;  %647 = vmatprep.subr.bf16.mxu1 %v630_v19 }
  0x6d   : > { %633 = vmatpush3.bf16.msra.mxu0 %v630_v19  ;;  %655 = vmatpush3.bf16.msra.mxu1 %v630_v19 }
  0x6e   : > { %635 = vmatprep.subr.bf16.mxu0 %v634_v22  ;;  %648 = vmatprep.subr.bf16.mxu1 %v634_v22 }
  0x71   : > { %637 = vmatpush3.bf16.msra.mxu0 %v634_v22  ;;  %656 = vmatpush3.bf16.msra.mxu1 %v634_v22 }
  0x72   : > { %639 = vmatprep.subr.bf16.mxu0 %v638_v25  ;;  %649 = vmatprep.subr.bf16.mxu1 %v638_v25 }
  0x75   : > { %641 = vmatpush3.bf16.msra.mxu0 %v638_v25  ;;  %657 = vmatpush3.bf16.msra.mxu1 %v638_v25 }
  0x78   : > { %587 = vmatmul.mubr.f32.vlgmr.msra.gmra.mrb[0].mxu0 %v207_v26  ;;  %599 = vmatmul.mubr.f32.vlgmr.msra.gmra.mrb[0].mxu1 %v215_v27 }
  0x79   : > { %589 = vmatprep.mubr.f32.mxu0 %v208_v28  ;;  %601 = vmatprep.mubr.f32.mxu1 %v216_v29 }
  0x7c   : > { %590 = vmatmul.mubr.f32.gmra.mrb[2].mxu0 %v209_v30  ;;  %602 = vmatmul.mubr.f32.gmra.mrb[2].mxu1 %v217_v31 }
  0x7d   : > { %592 = vmatprep.mubr.f32.mxu0 %v210_v32  ;;  %604 = vmatprep.mubr.f32.mxu1 %v218_v33 }
  0x80   : > { %593 = vmatmul.mubr.f32.gmra.mrb[4].mxu0 %v211_v34  ;;  %605 = vmatmul.mubr.f32.gmra.mrb[4].mxu1 %v219_v35 }
  0x81   : > { %595 = vmatprep.mubr.f32.mxu0 %v212_v36  ;;  %607 = vmatprep.mubr.f32.mxu1 %v220_v37 }
  0x84   : > { %596 = vmatmul.mubr.f32.gmra.mrb[6].mxu0 %v213_v38  ;;  %608 = vmatmul.mubr.f32.gmra.mrb[6].mxu1 %v221_v39 }
 0x14b   : > { %v588_v41 = vpop.f32.mrb[0].mxu0  ;;  %v600_v42 = vpop.f32.mrb[0].mxu1 }
 0x14c   : > { %v317_v43 = vadd.f32 %v588_v41, %v514_v40  ;;  %v357_v44 = vadd.f32 %v600_v42, %v514_v40  ;;  %v311_v45 = vpop.f32.mrb[1].mxu0  ;;  %v351_v46 = vpop.f32.mrb[1].mxu1 }
 0x14d   : > { %v312_v47 = vadd.f32 %v514_v40, %v311_v45  ;;  %v352_v48 = vadd.f32 %v514_v40, %v351_v46 }
 0x14e   : > { %391 = vst [vmem:[%s1058_s8 + $0x8] sm:$0xff] %v317_v43  ;;  %399 = vst [vmem:[%s1058_s8 + $0x48] sm:$0xff] %v357_v44 }
 0x14f   : > { %390 = vst [vmem:[%s1058_s8] sm:$0xff] %v312_v47  ;;  %398 = vst [vmem:[%s1058_s8 + $0x40] sm:$0xff] %v352_v48  ;;  %v591_v49 = vpop.f32.mrb[2].mxu0  ;;  %v603_v50 = vpop.f32.mrb[2].mxu1 }
 0x150   : > { %v327_v51 = vadd.f32 %v591_v49, %v514_v40  ;;  %v367_v52 = vadd.f32 %v603_v50, %v514_v40  ;;  %v321_v53 = vpop.f32.mrb[3].mxu0  ;;  %v361_v54 = vpop.f32.mrb[3].mxu1 }
 0x151   : > { %v322_v55 = vadd.f32 %v514_v40, %v321_v53  ;;  %v362_v56 = vadd.f32 %v514_v40, %v361_v54 }
 0x152   : > { %393 = vst [vmem:[%s1058_s8 + $0x18] sm:$0xff] %v327_v51  ;;  %401 = vst [vmem:[%s1058_s8 + $0x58] sm:$0xff] %v367_v52 }
 0x153   : > { %392 = vst [vmem:[%s1058_s8 + $0x10] sm:$0xff] %v322_v55  ;;  %400 = vst [vmem:[%s1058_s8 + $0x50] sm:$0xff] %v362_v56  ;;  %v594_v57 = vpop.f32.mrb[4].mxu0  ;;  %v606_v58 = vpop.f32.mrb[4].mxu1 }
 0x154   : > { %v337_v59 = vadd.f32 %v594_v57, %v514_v40  ;;  %v377_v60 = vadd.f32 %v606_v58, %v514_v40  ;;  %v331_v61 = vpop.f32.mrb[5].mxu0  ;;  %v371_v62 = vpop.f32.mrb[5].mxu1 }
 0x155   : > { %v332_v63 = vadd.f32 %v514_v40, %v331_v61  ;;  %v372_v0 = vadd.f32 %v514_v40, %v371_v62 }
 0x156   : > { %395 = vst [vmem:[%s1058_s8 + $0x28] sm:$0xff] %v337_v59  ;;  %403 = vst [vmem:[%s1058_s8 + $0x68] sm:$0xff] %v377_v60 }
 0x157   : > { %394 = vst [vmem:[%s1058_s8 + $0x20] sm:$0xff] %v332_v63  ;;  %402 = vst [vmem:[%s1058_s8 + $0x60] sm:$0xff] %v372_v0  ;;  %v597_v1 = vpop.f32.mrb[6].mxu0  ;;  %v609_v2 = vpop.f32.mrb[6].mxu1 }
 0x158   : > { %v347_v3 = vadd.f32 %v597_v1, %v514_v40  ;;  %v387_v4 = vadd.f32 %v609_v2, %v514_v40  ;;  %v341_v5 = vpop.f32.mrb[7].mxu0  ;;  %v381_v6 = vpop.f32.mrb[7].mxu1 }
 0x159   : > { %v342_v7 = vadd.f32 %v514_v40, %v341_v5  ;;  %v382_v8 = vadd.f32 %v514_v40, %v381_v6 }
 0x15a   : > { %397 = vst [vmem:[%s1058_s8 + $0x38] sm:$0xff] %v347_v3  ;;  %405 = vst [vmem:[%s1058_s8 + $0x78] sm:$0xff] %v387_v4 }
 0x15b   : > { %396 = vst [vmem:[%s1058_s8 + $0x30] sm:$0xff] %v342_v7  ;;  %404 = vst [vmem:[%s1058_s8 + $0x70] sm:$0xff] %v382_v8 }
 0x15c   : > { %790 = shalt.err (!%p787_p7)
}
 0x15d   : > { %s791_s30 = scalar_lea.hbm %s1077_s16, 2048  ;;  %s795_s10 = scalar_lea.hbm %s1130_s3, 4096 }
 0x15e   : > { %p792_p9 = scmp.ne.s32.totalorder %s1077_s16, %s791_s30  ;;  %p796_p5 = scmp.lt.u32.totalorder %s1077_s16, %s1130_s3 }
 0x15f   : > { %p797_p11 = scmp.lt.u32.totalorder %s795_s10, %s791_s30  ;;  %p799_p4 = scmp.lt.u32.totalorder %s791_s30, %s1077_s16 }
 0x160   : > { %p793_p1 = pnand %p792_p9, %p970_p12 }
 0x161   : > { %p798_p2 = por %p797_p11, %p796_p5 }
 0x162   : > { %p794_p0 = pneg %p793_p1 }
 0x163   : > { %p800_p6 = por %p799_p4, %p798_p2 }
 0x165   : > { %p801_p8 = pnand %p800_p6, %p794_p0 }
 0x167   : > { %804 = shalt.err (!%p801_p8)
}
 0x168   : > { %s854_s20 = smov 128   ;;  %s855_s8 = smov 8  }
 0x169   : > { %664 = dma.vmem_to_hbm [thread:$0]  (%p970_p12), %s1079_s4, 2048, %s1077_s16, %s407_s11, %s854_s20, %s854_s20, %s855_s8  }
 0x16a PF: > { %s435_s9 = sand.u32 1, %s835_s12   ;;  %p1145_p10 = scmp.ne.s32.totalorder %s1135_s19, 0 }
 0x16b   : > { %p1146_p13 = scmp.ge.s32.totalorder %s847_s15, 2  ;;  %s436_s25 = scalar_lea.sflag [#allocation4], %s435_s9 }
 0x16d   : > { %p675_p3 = pnand %p1146_p13, %p1145_p10 }
 0x16f   : > { %830 = dma.done.wait (!%p675_p3), %s436_s25, 2048  }
 0x170   : > { %832 = vsyncadd (!%p675_p3), %s436_s25, 4294965248  ;;  %p17_p7 = scmp.ge.s32.totalorder %s932_s24, 4   ;;  %s1147_s12 = smov %s839_s13 }
 0x171   : > { %s1148_s13 = smov %s843_s14  ;;  %s1149_s14 = smov %s966_s17 }
 0x172   : > { %s1150_s15 = smov %s932_s24  ;;  %19 = sbr.rel (!%p17_p7) target bundleno = 6 (0x6), region = 81 }
 0x179   :  { %441 = vsyncpa [#allocation3], 1 }
 0x17a   :  { %443 = vsyncpa [#allocation3 + $0x1], 1 }
 0x17b   :  { %444 = vsyncpa [#allocation6], 1 }
 0x17c   :  { %445 = vsyncpa [#allocation4], 1 }
 0x17d   :  { %447 = vsyncpa [#allocation4 + $0x1], 1 }

</bundles_post_ra>
